<compile_context>
chip_gen: v6e
topology: v6e:2x2x1
jax: 0.10.0
libtpu: 0.0.40
codegen_flags: <defaults>
</compile_context>

<pallas_src>
import functools

import jax
import jax.numpy as jnp
from jax import lax
from jax.experimental import pallas as pl
from jax.experimental.pallas import tpu as pltpu


def _dwconv1d_cl_kernel(x_ref, w_ref, b_ref, o_ref, xpad_ref, *,
                        pad_left, pad_right, t_in, k_size, chunk_t):
    """Channels-last depthwise conv1d tile.

    x_ref    : (T, tile_c)       unpadded input tile (time on sublanes)
    w_ref    : (K, tile_c)       depthwise weights, one row per tap
    b_ref    : (1, tile_c)       bias row
    o_ref    : (T_out, tile_c)   output tile (channels on lanes -> lane-dense)
    xpad_ref : (T_pad, tile_c)   VMEM scratch holding the zero halo
    """
    t_out, tile_c = o_ref.shape

    # Zero the halo rows (K-1 rows total: tiny) and land the input at its
    # sublane offset.  Channels stay on lanes, so this staging store is
    # lane-aligned (no masked/rotated lane stores as in the old (C,T) layout).
    if pad_left > 0:
        xpad_ref[:pad_left, :] = jnp.zeros((pad_left, tile_c), xpad_ref.dtype)
    if pad_right > 0:
        xpad_ref[pad_left + t_in:, :] = jnp.zeros((pad_right, tile_c),
                                                  xpad_ref.dtype)
    xpad_ref[pad_left:pad_left + t_in, :] = x_ref[...]

    bias_row = b_ref[...].astype(jnp.float32)            # (1, tile_c)

    def compute_chunk(t0, rows):
        # Accumulate `rows` output time-steps in registers (f32).  Each tap is
        # a sublane-shifted window load times a broadcast weight row: pure
        # vld + VPU work, no XLU, no ref round-trips on the accumulator.
        win = xpad_ref[pl.ds(t0, rows), :].astype(jnp.float32)
        acc = bias_row + win * w_ref[0:1, :].astype(jnp.float32)   # tap 0 + bias
        for k in range(1, k_size):                                  # K is static
            win = xpad_ref[pl.ds(t0 + k, rows), :].astype(jnp.float32)
            acc = acc + win * w_ref[k:k + 1, :].astype(jnp.float32)
        o_ref[pl.ds(t0, rows), :] = acc.astype(o_ref.dtype)

    n_full = t_out // chunk_t
    if n_full > 0:
        def body(i, carry):
            compute_chunk(pl.multiple_of(i * chunk_t, chunk_t), chunk_t)
            return carry
        lax.fori_loop(0, n_full, body, 0, unroll=True)

    tail = t_out - n_full * chunk_t
    if tail > 0:
        compute_chunk(n_full * chunk_t, tail)


def _vmem_need_bytes(tile_c, t_in, t_out, k_size, itemsize):
    t_pad = t_out + k_size - 1
    # double-buffered input/output blocks + halo scratch + weights/bias
    return itemsize * tile_c * (2 * t_in + 2 * t_out + t_pad + 2 * k_size + 2)


def _pick_channel_tile(c, t_in, t_out, k_size, itemsize, batch,
                       budget=12 << 20):
    """Largest 128-multiple channel tile dividing C that fits the budget."""
    if c % 128 != 0:
        return c                      # small / odd C: single full-extent block
    cands = [tc for tc in (1024, 512, 256, 128) if tc <= c and c % tc == 0]
    if not cands:
        return c
    # Ensure >= 2 grid steps when batch alone gives no parallelism (v7x cores).
    if batch == 1 and c // cands[0] < 2 and len(cands) > 1:
        cands = cands[1:]
    for tc in cands:
        if _vmem_need_bytes(tc, t_in, t_out, k_size, itemsize) <= budget:
            return tc
    return cands[-1]


def depthwise_conv1d_channels_last(x_btc, weight_kc, bias, padding):
    """x_btc: (B, T, C); weight_kc: (K, C); bias: (C,). Returns (B, T_out, C)."""
    B, T, C = x_btc.shape
    K = weight_kc.shape[0]
    pad_l, pad_r = padding
    T_out = T + pad_l + pad_r - K + 1
    T_pad = T_out + K - 1

    itemsize = jnp.dtype(x_btc.dtype).itemsize
    tile_c = _pick_channel_tile(C, T, T_out, K, itemsize, B)
    n_ct = C // tile_c

    # Time chunk sized so (acc + one window) stay within a handful of vregs.
    chunk_t = max(8, min(128, (8192 // max(tile_c, 1)) // 8 * 8))

    kernel = functools.partial(
        _dwconv1d_cl_kernel, pad_left=pad_l, pad_right=pad_r,
        t_in=T, k_size=K, chunk_t=chunk_t)

    cost = pl.CostEstimate(
        flops=2 * B * C * T_out * K,
        transcendentals=0,
        bytes_accessed=(B * C * T + B * C * T_out + C * K + C) * itemsize)

    need = _vmem_need_bytes(tile_c, T, T_out, K, itemsize)
    vmem_limit = int(min(max(need + (4 << 20), 16 << 20), 32 << 20))

    bias2d = bias.reshape(1, C)

    return pl.pallas_call(
        kernel,
        out_shape=jax.ShapeDtypeStruct((B, T_out, C), x_btc.dtype),
        grid_spec=pltpu.PrefetchScalarGridSpec(
            num_scalar_prefetch=0,
            grid=(B, n_ct),
            in_specs=[
                pl.BlockSpec((None, T, tile_c), lambda b, c: (b, 0, c)),
                pl.BlockSpec((K, tile_c), lambda b, c: (0, c)),
                pl.BlockSpec((1, tile_c), lambda b, c: (0, c)),
            ],
            out_specs=pl.BlockSpec((None, T_out, tile_c),
                                   lambda b, c: (b, 0, c)),
            scratch_shapes=[pltpu.VMEM((T_pad, tile_c), x_btc.dtype)],
        ),
        compiler_params=pltpu.CompilerParams(
            dimension_semantics=("parallel", "parallel"),
            vmem_limit_bytes=vmem_limit),
        cost_estimate=cost,
    )(x_btc, weight_kc, bias2d)


def depthwise_conv1d(x, weight, bias, padding):
    """PyTorch-layout entry point. x: (B, C, T), weight: (C, K), bias: (C,).

    Returns (B, C, T_out), matching F.pad + nn.Conv1d(C, C, K, groups=C).
    Inside ConformerConvModule the surrounding ops are channels-last, so real
    callers should use depthwise_conv1d_channels_last directly and the two
    transposes below (pure XLA, outside the kernel) disappear.
    """
    x_btc = jnp.transpose(x, (0, 2, 1))
    out_btc = depthwise_conv1d_channels_last(x_btc, weight.T, bias, padding)
    return jnp.transpose(out_btc, (0, 2, 1))


def _reference_dwconv1d(x, weight, bias, padding):
    """Pure-JAX reference matching F.pad + nn.Conv1d(groups=C)."""
    x_pad = jnp.pad(x, ((0, 0), (0, 0), (padding[0], padding[1])))
    B, C, T_pad = x_pad.shape
    K = weight.shape[1]
    T_out = T_pad - K + 1
    out = jnp.zeros((B, C, T_out), jnp.float32) + bias.reshape(1, C, 1)
    for k in range(K):
        out = out + x_pad[:, :, k:k + T_out] * weight[:, k].reshape(1, C, 1)
    return out.astype(x.dtype)


def _run_case(key, B, C, T, K, padding):
    kx, kw, kb = jax.random.split(key, 3)
    x = jax.random.normal(kx, (B, C, T), dtype=jnp.float32)
    bound = 1.0 / (K ** 0.5)      # matches nn.Conv1d uniform bound scale
    weight = jax.random.uniform(kw, (C, K), jnp.float32, -bound, bound)
    bias = jax.random.uniform(kb, (C,), jnp.float32, -bound, bound)

    out = jax.block_until_ready(depthwise_conv1d(x, weight, bias, padding))
    ref = _reference_dwconv1d(x, weight, bias, padding)
    assert out.shape == ref.shape, (out.shape, ref.shape)
    assert jnp.allclose(out, ref, atol=2e-5, rtol=2e-5)


if __name__ == "__main__":
    key = jax.random.PRNGKey(0)
    k1, k2, k3, k4 = jax.random.split(key, 4)

    # Conformer-style "same" padding depthwise conv, K=31, tiny C (< 128 lanes).
    _run_case(k1, B=2, C=16, T=32, K=31, padding=(15, 15))

    # C multiple of 128 with B=1 -> channel-tiling grid axis (tile_c=128, 2 tiles).
    _run_case(k2, B=1, C=256, T=48, K=31, padding=(15, 15))

    # Longer time axis -> exercises the unrolled fori_loop chunks + tail chunk.
    _run_case(k3, B=1, C=128, T=200, K=31, padding=(15, 15))

    # Causal variant (pad_right == 0), small kernel.
    _run_case(k4, B=2, C=8, T=64, K=3, padding=(2, 0))

    print("KERNEL_OK")
</pallas_src>

<mosaic_0001>
module attributes {stable_mosaic.version = 11 : i64} {
  func.func @_dwconv1d_cl_kernel(%arg0: i32, %arg1: i32, %arg2: memref<1x32x16xf32, #tpu.memory_space<vmem>>, %arg3: memref<31x16xf32, #tpu.memory_space<vmem>>, %arg4: memref<1x16xf32, #tpu.memory_space<vmem>>, %arg5: memref<1x32x16xf32, #tpu.memory_space<vmem>>, %arg6: memref<62x16xf32, #tpu.memory_space<vmem>>) attributes {dimension_semantics = [#tpu.dimension_semantics<parallel>, #tpu.dimension_semantics<parallel>], iteration_bounds = array<i64: 2, 1>, scalar_prefetch = 0 : i64, scratch_operands = 1 : i64, tpu.core_type = #tpu.core_type<tc>, window_params = [{transform_indices = @transform_0, window_bounds = array<i64: 1, 32, 16>}, {transform_indices = @transform_1, window_bounds = array<i64: 31, 16>}, {transform_indices = @transform_2, window_bounds = array<i64: 1, 16>}, {transform_indices = @transform_3, window_bounds = array<i64: 1, 32, 16>}]} {
    %cst = arith.constant 0.000000e+00 : f32
    %0 = vector.broadcast %cst : f32 to vector<15x16xf32>
    %c0 = arith.constant 0 : index
    %c0_0 = arith.constant 0 : index
    %1 = vector.load %arg6[%c0, %c0_0] : memref<62x16xf32, #tpu.memory_space<vmem>>, vector<15x16xf32>
    tpu.vector_store %arg6[%c0, %c0_0], %0 {strides = array<i32>} : memref<62x16xf32, #tpu.memory_space<vmem>>, vector<15x16xf32>,
    %cst_1 = arith.constant 0.000000e+00 : f32
    %2 = vector.broadcast %cst_1 : f32 to vector<15x16xf32>
    %c47 = arith.constant 47 : index
    %c0_2 = arith.constant 0 : index
    %3 = vector.load %arg6[%c47, %c0_2] : memref<62x16xf32, #tpu.memory_space<vmem>>, vector<15x16xf32>
    tpu.vector_store %arg6[%c47, %c0_2], %2 {strides = array<i32>} : memref<62x16xf32, #tpu.memory_space<vmem>>, vector<15x16xf32>,
    %c0_3 = arith.constant 0 : index
    %c0_4 = arith.constant 0 : index
    %c0_5 = arith.constant 0 : index
    %4 = vector.load %arg2[%c0_3, %c0_4, %c0_5] : memref<1x32x16xf32, #tpu.memory_space<vmem>>, vector<1x32x16xf32>
    %5 = vector.shape_cast %4 : vector<1x32x16xf32> to vector<32x16xf32>
    %c15 = arith.constant 15 : index
    %c0_6 = arith.constant 0 : index
    %6 = vector.load %arg6[%c15, %c0_6] : memref<62x16xf32, #tpu.memory_space<vmem>>, vector<32x16xf32>
    tpu.vector_store %arg6[%c15, %c0_6], %5 {strides = array<i32>} : memref<62x16xf32, #tpu.memory_space<vmem>>, vector<32x16xf32>,
    %c0_7 = arith.constant 0 : index
    %c0_8 = arith.constant 0 : index
    %7 = vector.load %arg4[%c0_7, %c0_8] : memref<1x16xf32, #tpu.memory_space<vmem>>, vector<1x16xf32>
    %c0_9 = arith.constant 0 : index
    %c0_10 = arith.constant 0 : index
    %8 = vector.load %arg6[%c0_9, %c0_10] : memref<62x16xf32, #tpu.memory_space<vmem>>, vector<32x16xf32>
    %c0_11 = arith.constant 0 : index
    %c0_12 = arith.constant 0 : index
    %9 = vector.load %arg3[%c0_11, %c0_12] : memref<31x16xf32, #tpu.memory_space<vmem>>, vector<1x16xf32>
    %10 = vector.broadcast %9 : vector<1x16xf32> to vector<32x16xf32>
    %11 = arith.mulf %8, %10 : vector<32x16xf32>
    %12 = vector.broadcast %7 : vector<1x16xf32> to vector<32x16xf32>
    %13 = arith.addf %12, %11 : vector<32x16xf32>
    %c1 = arith.constant 1 : index
    %c0_13 = arith.constant 0 : index
    %14 = vector.load %arg6[%c1, %c0_13] : memref<62x16xf32, #tpu.memory_space<vmem>>, vector<32x16xf32>
    %c1_14 = arith.constant 1 : index
    %c0_15 = arith.constant 0 : index
    %15 = vector.load %arg3[%c1_14, %c0_15] : memref<31x16xf32, #tpu.memory_space<vmem>>, vector<1x16xf32>
    %16 = vector.broadcast %15 : vector<1x16xf32> to vector<32x16xf32>
    %17 = arith.mulf %14, %16 : vector<32x16xf32>
    %18 = arith.addf %13, %17 : vector<32x16xf32>
    %c2 = arith.constant 2 : index
    %c0_16 = arith.constant 0 : index
    %19 = vector.load %arg6[%c2, %c0_16] : memref<62x16xf32, #tpu.memory_space<vmem>>, vector<32x16xf32>
    %c2_17 = arith.constant 2 : index
    %c0_18 = arith.constant 0 : index
    %20 = vector.load %arg3[%c2_17, %c0_18] : memref<31x16xf32, #tpu.memory_space<vmem>>, vector<1x16xf32>
    %21 = vector.broadcast %20 : vector<1x16xf32> to vector<32x16xf32>
    %22 = arith.mulf %19, %21 : vector<32x16xf32>
    %23 = arith.addf %18, %22 : vector<32x16xf32>
    %c3 = arith.constant 3 : index
    %c0_19 = arith.constant 0 : index
    %24 = vector.load %arg6[%c3, %c0_19] : memref<62x16xf32, #tpu.memory_space<vmem>>, vector<32x16xf32>
    %c3_20 = arith.constant 3 : index
    %c0_21 = arith.constant 0 : index
    %25 = vector.load %arg3[%c3_20, %c0_21] : memref<31x16xf32, #tpu.memory_space<vmem>>, vector<1x16xf32>
    %26 = vector.broadcast %25 : vector<1x16xf32> to vector<32x16xf32>
    %27 = arith.mulf %24, %26 : vector<32x16xf32>
    %28 = arith.addf %23, %27 : vector<32x16xf32>
    %c4 = arith.constant 4 : index
    %c0_22 = arith.constant 0 : index
    %29 = vector.load %arg6[%c4, %c0_22] : memref<62x16xf32, #tpu.memory_space<vmem>>, vector<32x16xf32>
    %c4_23 = arith.constant 4 : index
    %c0_24 = arith.constant 0 : index
    %30 = vector.load %arg3[%c4_23, %c0_24] : memref<31x16xf32, #tpu.memory_space<vmem>>, vector<1x16xf32>
    %31 = vector.broadcast %30 : vector<1x16xf32> to vector<32x16xf32>
    %32 = arith.mulf %29, %31 : vector<32x16xf32>
    %33 = arith.addf %28, %32 : vector<32x16xf32>
    %c5 = arith.constant 5 : index
    %c0_25 = arith.constant 0 : index
    %34 = vector.load %arg6[%c5, %c0_25] : memref<62x16xf32, #tpu.memory_space<vmem>>, vector<32x16xf32>
    %c5_26 = arith.constant 5 : index
    %c0_27 = arith.constant 0 : index
    %35 = vector.load %arg3[%c5_26, %c0_27] : memref<31x16xf32, #tpu.memory_space<vmem>>, vector<1x16xf32>
    %36 = vector.broadcast %35 : vector<1x16xf32> to vector<32x16xf32>
    %37 = arith.mulf %34, %36 : vector<32x16xf32>
    %38 = arith.addf %33, %37 : vector<32x16xf32>
    %c6 = arith.constant 6 : index
    %c0_28 = arith.constant 0 : index
    %39 = vector.load %arg6[%c6, %c0_28] : memref<62x16xf32, #tpu.memory_space<vmem>>, vector<32x16xf32>
    %c6_29 = arith.constant 6 : index
    %c0_30 = arith.constant 0 : index
    %40 = vector.load %arg3[%c6_29, %c0_30] : memref<31x16xf32, #tpu.memory_space<vmem>>, vector<1x16xf32>
    %41 = vector.broadcast %40 : vector<1x16xf32> to vector<32x16xf32>
    %42 = arith.mulf %39, %41 : vector<32x16xf32>
    %43 = arith.addf %38, %42 : vector<32x16xf32>
    %c7 = arith.constant 7 : index
    %c0_31 = arith.constant 0 : index
    %44 = vector.load %arg6[%c7, %c0_31] : memref<62x16xf32, #tpu.memory_space<vmem>>, vector<32x16xf32>
    %c7_32 = arith.constant 7 : index
    %c0_33 = arith.constant 0 : index
    %45 = vector.load %arg3[%c7_32, %c0_33] : memref<31x16xf32, #tpu.memory_space<vmem>>, vector<1x16xf32>
    %46 = vector.broadcast %45 : vector<1x16xf32> to vector<32x16xf32>
    %47 = arith.mulf %44, %46 : vector<32x16xf32>
    %48 = arith.addf %43, %47 : vector<32x16xf32>
    %c8 = arith.constant 8 : index
    %c0_34 = arith.constant 0 : index
    %49 = vector.load %arg6[%c8, %c0_34] : memref<62x16xf32, #tpu.memory_space<vmem>>, vector<32x16xf32>
    %c8_35 = arith.constant 8 : index
    %c0_36 = arith.constant 0 : index
    %50 = vector.load %arg3[%c8_35, %c0_36] : memref<31x16xf32, #tpu.memory_space<vmem>>, vector<1x16xf32>
    %51 = vector.broadcast %50 : vector<1x16xf32> to vector<32x16xf32>
    %52 = arith.mulf %49, %51 : vector<32x16xf32>
    %53 = arith.addf %48, %52 : vector<32x16xf32>
    %c9 = arith.constant 9 : index
    %c0_37 = arith.constant 0 : index
    %54 = vector.load %arg6[%c9, %c0_37] : memref<62x16xf32, #tpu.memory_space<vmem>>, vector<32x16xf32>
    %c9_38 = arith.constant 9 : index
    %c0_39 = arith.constant 0 : index
    %55 = vector.load %arg3[%c9_38, %c0_39] : memref<31x16xf32, #tpu.memory_space<vmem>>, vector<1x16xf32>
    %56 = vector.broadcast %55 : vector<1x16xf32> to vector<32x16xf32>
    %57 = arith.mulf %54, %56 : vector<32x16xf32>
    %58 = arith.addf %53, %57 : vector<32x16xf32>
    %c10 = arith.constant 10 : index
    %c0_40 = arith.constant 0 : index
    %59 = vector.load %arg6[%c10, %c0_40] : memref<62x16xf32, #tpu.memory_space<vmem>>, vector<32x16xf32>
    %c10_41 = arith.constant 10 : index
    %c0_42 = arith.constant 0 : index
    %60 = vector.load %arg3[%c10_41, %c0_42] : memref<31x16xf32, #tpu.memory_space<vmem>>, vector<1x16xf32>
    %61 = vector.broadcast %60 : vector<1x16xf32> to vector<32x16xf32>
    %62 = arith.mulf %59, %61 : vector<32x16xf32>
    %63 = arith.addf %58, %62 : vector<32x16xf32>
    %c11 = arith.constant 11 : index
    %c0_43 = arith.constant 0 : index
    %64 = vector.load %arg6[%c11, %c0_43] : memref<62x16xf32, #tpu.memory_space<vmem>>, vector<32x16xf32>
    %c11_44 = arith.constant 11 : index
    %c0_45 = arith.constant 0 : index
    %65 = vector.load %arg3[%c11_44, %c0_45] : memref<31x16xf32, #tpu.memory_space<vmem>>, vector<1x16xf32>
    %66 = vector.broadcast %65 : vector<1x16xf32> to vector<32x16xf32>
    %67 = arith.mulf %64, %66 : vector<32x16xf32>
    %68 = arith.addf %63, %67 : vector<32x16xf32>
    %c12 = arith.constant 12 : index
    %c0_46 = arith.constant 0 : index
    %69 = vector.load %arg6[%c12, %c0_46] : memref<62x16xf32, #tpu.memory_space<vmem>>, vector<32x16xf32>
    %c12_47 = arith.constant 12 : index
    %c0_48 = arith.constant 0 : index
    %70 = vector.load %arg3[%c12_47, %c0_48] : memref<31x16xf32, #tpu.memory_space<vmem>>, vector<1x16xf32>
    %71 = vector.broadcast %70 : vector<1x16xf32> to vector<32x16xf32>
    %72 = arith.mulf %69, %71 : vector<32x16xf32>
    %73 = arith.addf %68, %72 : vector<32x16xf32>
    %c13 = arith.constant 13 : index
    %c0_49 = arith.constant 0 : index
    %74 = vector.load %arg6[%c13, %c0_49] : memref<62x16xf32, #tpu.memory_space<vmem>>, vector<32x16xf32>
    %c13_50 = arith.constant 13 : index
    %c0_51 = arith.constant 0 : index
    %75 = vector.load %arg3[%c13_50, %c0_51] : memref<31x16xf32, #tpu.memory_space<vmem>>, vector<1x16xf32>
    %76 = vector.broadcast %75 : vector<1x16xf32> to vector<32x16xf32>
    %77 = arith.mulf %74, %76 : vector<32x16xf32>
    %78 = arith.addf %73, %77 : vector<32x16xf32>
    %c14 = arith.constant 14 : index
    %c0_52 = arith.constant 0 : index
    %79 = vector.load %arg6[%c14, %c0_52] : memref<62x16xf32, #tpu.memory_space<vmem>>, vector<32x16xf32>
    %c14_53 = arith.constant 14 : index
    %c0_54 = arith.constant 0 : index
    %80 = vector.load %arg3[%c14_53, %c0_54] : memref<31x16xf32, #tpu.memory_space<vmem>>, vector<1x16xf32>
    %81 = vector.broadcast %80 : vector<1x16xf32> to vector<32x16xf32>
    %82 = arith.mulf %79, %81 : vector<32x16xf32>
    %83 = arith.addf %78, %82 : vector<32x16xf32>
    %c15_55 = arith.constant 15 : index
    %c0_56 = arith.constant 0 : index
    %84 = vector.load %arg6[%c15_55, %c0_56] : memref<62x16xf32, #tpu.memory_space<vmem>>, vector<32x16xf32>
    %c15_57 = arith.constant 15 : index
    %c0_58 = arith.constant 0 : index
    %85 = vector.load %arg3[%c15_57, %c0_58] : memref<31x16xf32, #tpu.memory_space<vmem>>, vector<1x16xf32>
    %86 = vector.broadcast %85 : vector<1x16xf32> to vector<32x16xf32>
    %87 = arith.mulf %84, %86 : vector<32x16xf32>
    %88 = arith.addf %83, %87 : vector<32x16xf32>
    %c16 = arith.constant 16 : index
    %c0_59 = arith.constant 0 : index
    %89 = vector.load %arg6[%c16, %c0_59] : memref<62x16xf32, #tpu.memory_space<vmem>>, vector<32x16xf32>
    %c16_60 = arith.constant 16 : index
    %c0_61 = arith.constant 0 : index
    %90 = vector.load %arg3[%c16_60, %c0_61] : memref<31x16xf32, #tpu.memory_space<vmem>>, vector<1x16xf32>
    %91 = vector.broadcast %90 : vector<1x16xf32> to vector<32x16xf32>
    %92 = arith.mulf %89, %91 : vector<32x16xf32>
    %93 = arith.addf %88, %92 : vector<32x16xf32>
    %c17 = arith.constant 17 : index
    %c0_62 = arith.constant 0 : index
    %94 = vector.load %arg6[%c17, %c0_62] : memref<62x16xf32, #tpu.memory_space<vmem>>, vector<32x16xf32>
    %c17_63 = arith.constant 17 : index
    %c0_64 = arith.constant 0 : index
    %95 = vector.load %arg3[%c17_63, %c0_64] : memref<31x16xf32, #tpu.memory_space<vmem>>, vector<1x16xf32>
    %96 = vector.broadcast %95 : vector<1x16xf32> to vector<32x16xf32>
    %97 = arith.mulf %94, %96 : vector<32x16xf32>
    %98 = arith.addf %93, %97 : vector<32x16xf32>
    %c18 = arith.constant 18 : index
    %c0_65 = arith.constant 0 : index
    %99 = vector.load %arg6[%c18, %c0_65] : memref<62x16xf32, #tpu.memory_space<vmem>>, vector<32x16xf32>
    %c18_66 = arith.constant 18 : index
    %c0_67 = arith.constant 0 : index
    %100 = vector.load %arg3[%c18_66, %c0_67] : memref<31x16xf32, #tpu.memory_space<vmem>>, vector<1x16xf32>
    %101 = vector.broadcast %100 : vector<1x16xf32> to vector<32x16xf32>
    %102 = arith.mulf %99, %101 : vector<32x16xf32>
    %103 = arith.addf %98, %102 : vector<32x16xf32>
    %c19 = arith.constant 19 : index
    %c0_68 = arith.constant 0 : index
    %104 = vector.load %arg6[%c19, %c0_68] : memref<62x16xf32, #tpu.memory_space<vmem>>, vector<32x16xf32>
    %c19_69 = arith.constant 19 : index
    %c0_70 = arith.constant 0 : index
    %105 = vector.load %arg3[%c19_69, %c0_70] : memref<31x16xf32, #tpu.memory_space<vmem>>, vector<1x16xf32>
    %106 = vector.broadcast %105 : vector<1x16xf32> to vector<32x16xf32>
    %107 = arith.mulf %104, %106 : vector<32x16xf32>
    %108 = arith.addf %103, %107 : vector<32x16xf32>
    %c20 = arith.constant 20 : index
    %c0_71 = arith.constant 0 : index
    %109 = vector.load %arg6[%c20, %c0_71] : memref<62x16xf32, #tpu.memory_space<vmem>>, vector<32x16xf32>
    %c20_72 = arith.constant 20 : index
    %c0_73 = arith.constant 0 : index
    %110 = vector.load %arg3[%c20_72, %c0_73] : memref<31x16xf32, #tpu.memory_space<vmem>>, vector<1x16xf32>
    %111 = vector.broadcast %110 : vector<1x16xf32> to vector<32x16xf32>
    %112 = arith.mulf %109, %111 : vector<32x16xf32>
    %113 = arith.addf %108, %112 : vector<32x16xf32>
    %c21 = arith.constant 21 : index
    %c0_74 = arith.constant 0 : index
    %114 = vector.load %arg6[%c21, %c0_74] : memref<62x16xf32, #tpu.memory_space<vmem>>, vector<32x16xf32>
    %c21_75 = arith.constant 21 : index
    %c0_76 = arith.constant 0 : index
    %115 = vector.load %arg3[%c21_75, %c0_76] : memref<31x16xf32, #tpu.memory_space<vmem>>, vector<1x16xf32>
    %116 = vector.broadcast %115 : vector<1x16xf32> to vector<32x16xf32>
    %117 = arith.mulf %114, %116 : vector<32x16xf32>
    %118 = arith.addf %113, %117 : vector<32x16xf32>
    %c22 = arith.constant 22 : index
    %c0_77 = arith.constant 0 : index
    %119 = vector.load %arg6[%c22, %c0_77] : memref<62x16xf32, #tpu.memory_space<vmem>>, vector<32x16xf32>
    %c22_78 = arith.constant 22 : index
    %c0_79 = arith.constant 0 : index
    %120 = vector.load %arg3[%c22_78, %c0_79] : memref<31x16xf32, #tpu.memory_space<vmem>>, vector<1x16xf32>
    %121 = vector.broadcast %120 : vector<1x16xf32> to vector<32x16xf32>
    %122 = arith.mulf %119, %121 : vector<32x16xf32>
    %123 = arith.addf %118, %122 : vector<32x16xf32>
    %c23 = arith.constant 23 : index
    %c0_80 = arith.constant 0 : index
    %124 = vector.load %arg6[%c23, %c0_80] : memref<62x16xf32, #tpu.memory_space<vmem>>, vector<32x16xf32>
    %c23_81 = arith.constant 23 : index
    %c0_82 = arith.constant 0 : index
    %125 = vector.load %arg3[%c23_81, %c0_82] : memref<31x16xf32, #tpu.memory_space<vmem>>, vector<1x16xf32>
    %126 = vector.broadcast %125 : vector<1x16xf32> to vector<32x16xf32>
    %127 = arith.mulf %124, %126 : vector<32x16xf32>
    %128 = arith.addf %123, %127 : vector<32x16xf32>
    %c24 = arith.constant 24 : index
    %c0_83 = arith.constant 0 : index
    %129 = vector.load %arg6[%c24, %c0_83] : memref<62x16xf32, #tpu.memory_space<vmem>>, vector<32x16xf32>
    %c24_84 = arith.constant 24 : index
    %c0_85 = arith.constant 0 : index
    %130 = vector.load %arg3[%c24_84, %c0_85] : memref<31x16xf32, #tpu.memory_space<vmem>>, vector<1x16xf32>
    %131 = vector.broadcast %130 : vector<1x16xf32> to vector<32x16xf32>
    %132 = arith.mulf %129, %131 : vector<32x16xf32>
    %133 = arith.addf %128, %132 : vector<32x16xf32>
    %c25 = arith.constant 25 : index
    %c0_86 = arith.constant 0 : index
    %134 = vector.load %arg6[%c25, %c0_86] : memref<62x16xf32, #tpu.memory_space<vmem>>, vector<32x16xf32>
    %c25_87 = arith.constant 25 : index
    %c0_88 = arith.constant 0 : index
    %135 = vector.load %arg3[%c25_87, %c0_88] : memref<31x16xf32, #tpu.memory_space<vmem>>, vector<1x16xf32>
    %136 = vector.broadcast %135 : vector<1x16xf32> to vector<32x16xf32>
    %137 = arith.mulf %134, %136 : vector<32x16xf32>
    %138 = arith.addf %133, %137 : vector<32x16xf32>
    %c26 = arith.constant 26 : index
    %c0_89 = arith.constant 0 : index
    %139 = vector.load %arg6[%c26, %c0_89] : memref<62x16xf32, #tpu.memory_space<vmem>>, vector<32x16xf32>
    %c26_90 = arith.constant 26 : index
    %c0_91 = arith.constant 0 : index
    %140 = vector.load %arg3[%c26_90, %c0_91] : memref<31x16xf32, #tpu.memory_space<vmem>>, vector<1x16xf32>
    %141 = vector.broadcast %140 : vector<1x16xf32> to vector<32x16xf32>
    %142 = arith.mulf %139, %141 : vector<32x16xf32>
    %143 = arith.addf %138, %142 : vector<32x16xf32>
    %c27 = arith.constant 27 : index
    %c0_92 = arith.constant 0 : index
    %144 = vector.load %arg6[%c27, %c0_92] : memref<62x16xf32, #tpu.memory_space<vmem>>, vector<32x16xf32>
    %c27_93 = arith.constant 27 : index
    %c0_94 = arith.constant 0 : index
    %145 = vector.load %arg3[%c27_93, %c0_94] : memref<31x16xf32, #tpu.memory_space<vmem>>, vector<1x16xf32>
    %146 = vector.broadcast %145 : vector<1x16xf32> to vector<32x16xf32>
    %147 = arith.mulf %144, %146 : vector<32x16xf32>
    %148 = arith.addf %143, %147 : vector<32x16xf32>
    %c28 = arith.constant 28 : index
    %c0_95 = arith.constant 0 : index
    %149 = vector.load %arg6[%c28, %c0_95] : memref<62x16xf32, #tpu.memory_space<vmem>>, vector<32x16xf32>
    %c28_96 = arith.constant 28 : index
    %c0_97 = arith.constant 0 : index
    %150 = vector.load %arg3[%c28_96, %c0_97] : memref<31x16xf32, #tpu.memory_space<vmem>>, vector<1x16xf32>
    %151 = vector.broadcast %150 : vector<1x16xf32> to vector<32x16xf32>
    %152 = arith.mulf %149, %151 : vector<32x16xf32>
    %153 = arith.addf %148, %152 : vector<32x16xf32>
    %c29 = arith.constant 29 : index
    %c0_98 = arith.constant 0 : index
    %154 = vector.load %arg6[%c29, %c0_98] : memref<62x16xf32, #tpu.memory_space<vmem>>, vector<32x16xf32>
    %c29_99 = arith.constant 29 : index
    %c0_100 = arith.constant 0 : index
    %155 = vector.load %arg3[%c29_99, %c0_100] : memref<31x16xf32, #tpu.memory_space<vmem>>, vector<1x16xf32>
    %156 = vector.broadcast %155 : vector<1x16xf32> to vector<32x16xf32>
    %157 = arith.mulf %154, %156 : vector<32x16xf32>
    %158 = arith.addf %153, %157 : vector<32x16xf32>
    %c30 = arith.constant 30 : index
    %c0_101 = arith.constant 0 : index
    %159 = vector.load %arg6[%c30, %c0_101] : memref<62x16xf32, #tpu.memory_space<vmem>>, vector<32x16xf32>
    %c30_102 = arith.constant 30 : index
    %c0_103 = arith.constant 0 : index
    %160 = vector.load %arg3[%c30_102, %c0_103] : memref<31x16xf32, #tpu.memory_space<vmem>>, vector<1x16xf32>
    %161 = vector.broadcast %160 : vector<1x16xf32> to vector<32x16xf32>
    %162 = arith.mulf %159, %161 : vector<32x16xf32>
    %163 = arith.addf %158, %162 : vector<32x16xf32>
    %c0_104 = arith.constant 0 : index
    %c0_105 = arith.constant 0 : index
    %c0_106 = arith.constant 0 : index
    %164 = vector.load %arg5[%c0_104, %c0_105, %c0_106] : memref<1x32x16xf32, #tpu.memory_space<vmem>>, vector<1x32x16xf32>
    %165 = vector.shape_cast %164 : vector<1x32x16xf32> to vector<32x16xf32>
    %166 = vector.shape_cast %163 : vector<32x16xf32> to vector<1x32x16xf32>
    tpu.vector_store %arg5[%c0_104, %c0_105, %c0_106], %166 {strides = array<i32>} : memref<1x32x16xf32, #tpu.memory_space<vmem>>, vector<1x32x16xf32>,
    return
  }
  func.func @transform_0(%arg0: i32, %arg1: i32) -> (i32, i32, i32) {
    %c0_i32 = arith.constant 0 : i32
    %c0_i32_0 = arith.constant 0 : i32
    return %arg0, %c0_i32, %arg1 : i32, i32, i32
  }
  func.func @transform_1(%arg0: i32, %arg1: i32) -> (i32, i32) {
    %c0_i32 = arith.constant 0 : i32
    %c0_i32_0 = arith.constant 0 : i32
    return %c0_i32, %arg1 : i32, i32
  }
  func.func @transform_2(%arg0: i32, %arg1: i32) -> (i32, i32) {
    %c0_i32 = arith.constant 0 : i32
    %c0_i32_0 = arith.constant 0 : i32
    return %c0_i32, %arg1 : i32, i32
  }
  func.func @transform_3(%arg0: i32, %arg1: i32) -> (i32, i32, i32) {
    %c0_i32 = arith.constant 0 : i32
    %c0_i32_0 = arith.constant 0 : i32
    return %arg0, %c0_i32, %arg1 : i32, i32, i32
  }
}

</mosaic_0001>

<bundles_post_ra>
// kernel: tpu_custom_call.1
= control target key start
LH: loop header
LB: loop body
LE: loop exit
PB: predicated region body
PF: predicated region fallthrough
CT: control target
= control target key end

     0   :  { %s944_s12 = smov 0   ;;  %s946_s13 = smov 0   ;;  %s1396_s0 = inlined_call_operand.vmem [shape: f32[2,32,16], index: 0, kind: input, shape index: {}]   ;;  %s1397_s1 = inlined_call_operand.vmem [shape: f32[31,16], index: 1, kind: input, shape index: {}]   ;;  %s1398_s2 = inlined_call_operand.vmem [shape: f32[1,16], index: 2, kind: input, shape index: {}]   ;;  %s1399_s3 = inlined_call_operand.vmem [shape: f32[2,32,16], index: 3, kind: output, shape index: {}]  }
   0x1   :  { %s948_s14 = smov 0  }
   0x2 LB: > { %s25_s15 = sadd.s32 1, %s917_s13  ;;  %p833_p0 = scmp.ge.s32.totalorder %s921_s14, 1  ;;  %s921_s14 = sphi %s948_s14, %s13_s14   ;;  %s917_s13 = sphi %s946_s13, %s1401_s13   ;;  %s913_s12 = sphi %s944_s12, %s1400_s12  }
   0x3   : > { %p27_p1 = scmp.ge.s32.totalorder %s25_s15, 2  ;;  %p173_p2 = scmp.lt.s32.totalorder %s921_s14, 3 }
   0x5   : > { %s1403_s15 = smov (%p27_p1, %s25_s15), 0  ;;  %p174_p3 = pnand %p833_p0, %p173_p2 }
   0x6   : > { %p210_p4 = scmp.lt.s32.totalorder (!%p174_p3), %s913_s12, 1 }
   0x7   : > { %177 = sbr.rel (%p174_p3) target bundleno = 97 (0x61), region = 32 }
   0xc   : > { %vm233_vm0 = vcmask 130048   ;;  %vm235_vm1 = vcmask 129024   ;;  %v923_v0 = vmov 0.0   ;;  %s1405_s12 = smov (!%p210_p4, %s913_s12), 1  ;;  %v838_v1 = vld [vmem:[%s1397_s1] ss:$0 sm:$0xff] }
   0xd   : > { %234 = vst.msk [vmem:[#allocation2] sm:$0xff] %vm233_vm0, %v923_v0  ;;  %237 = vst.msk [vmem:[#allocation2 + $0x2f] sm:$0xff] %vm233_vm0, %v923_v0  ;;  %s872_s16 = sshll.u32 %s1405_s12, 5  ;;  %v840_v2 = vld [vmem:[%s1397_s1 + $0x1] ss:$0 sm:$0xff] }
   0xe   : > { %236 = vst.msk [vmem:[#allocation2 + $0x8] sm:$0x7f] %vm235_vm1, %v923_v0  ;;  %238 = vst.msk [vmem:[#allocation2 + $0x37] sm:$0x7f] %vm235_vm1, %v923_v0  ;;  %s217_s19 = scalar_lea.vmem %s1396_s0, %s872_s16  ;;  %v839_v7 = vld [vmem:[%s1398_s2] ss:$0 sm:$0xff]  ;;  %s1365_s20 = scalar_lea.vmem %s1399_s3, %s872_s16 }
   0xf   : > { %v239_v3 = vld [vmem:[%s217_s19] sm:$0xff]  ;;  %v240_v4 = vld [vmem:[%s217_s19 + $0x8] sm:$0xff]  ;;  %v241_v5 = vld [vmem:[%s217_s19 + $0x10] sm:$0xff] }
  0x10   : > { %243 = vst.msk [vmem:[#allocation2 + $0xf] sm:$0xff] %vm233_vm0, %v239_v3  ;;  %244 = vst.msk [vmem:[#allocation2 + $0x17] sm:$0xff] %vm233_vm0, %v240_v4  ;;  %v242_v6 = vld [vmem:[%s217_s19 + $0x18] sm:$0xff]  ;;  %v841_v8 = vld [vmem:[%s1397_s1 + $0x2] ss:$0 sm:$0xff] }
  0x11   : > { %245 = vst.msk [vmem:[#allocation2 + $0x1f] sm:$0xff] %vm233_vm0, %v241_v5  ;;  %246 = vst.msk [vmem:[#allocation2 + $0x27] sm:$0xff] %vm233_vm0, %v242_v6  ;;  %v842_v17 = vld [vmem:[%s1397_s1 + $0x3] ss:$0 sm:$0xff]  ;;  %v998_v21 = vld [vmem:[%s1397_s1 + $0x4] ss:$0 sm:$0xff] }
  0x12   : > { %v844_v43 = vld [vmem:[%s1397_s1 + $0x5] ss:$0 sm:$0xff]  ;;  %v1038_v56 = vld [vmem:[%s1397_s1 + $0x6] ss:$0 sm:$0xff]  ;;  %v1050_v4 = vld [vmem:[%s1397_s1 + $0x7] ss:$0 sm:$0xff] }
  0x14   : > { %v248_v9 = vld [vmem:[#allocation2] sm:$0xff] }
  0x15   : > { %v271_v10 = vld [vmem:[#allocation2 + $0x1] sm:$0xff]  ;;  %v257_v12 = vmul.f32 %v838_v1, %v248_v9 }
  0x16   : > { %v288_v11 = vld [vmem:[#allocation2 + $0x2] sm:$0xff]  ;;  %v280_v13 = vmul.f32 %v840_v2, %v271_v10 }
  0x17   : > { %v267_v14 = vadd.f32 %v839_v7, %v257_v12  ;;  %v297_v15 = vmul.f32 %v841_v8, %v288_v11  ;;  %v305_v16 = vld [vmem:[#allocation2 + $0x3] sm:$0xff]  ;;  %v991_v19 = vld [vmem:[#allocation2 + $0x10] sm:$0xff] }
  0x18   : > { %v993_v20 = vld [vmem:[#allocation2 + $0x11] sm:$0xff]  ;;  %v1000_v22 = vld [vmem:[#allocation2 + $0x9] sm:$0xff]  ;;  %v259_v25 = vmul.f32 %v838_v1, %v991_v19  ;;  %v314_v27 = vmul.f32 %v842_v17, %v305_v16  ;;  %v1011_v31 = vld [vmem:[#allocation2 + $0x19] sm:$0xff] }
  0x19   : > { %v284_v18 = vadd.f32 %v280_v13, %v267_v14  ;;  %v1002_v23 = vld [vmem:[#allocation2 + $0x8] sm:$0xff]  ;;  %v1004_v24 = vld [vmem:[#allocation2 + $0x18] sm:$0xff]  ;;  %v282_v34 = vmul.f32 %v840_v2, %v993_v20  ;;  %v281_v39 = vmul.f32 %v840_v2, %v1000_v22  ;;  %v283_v40 = vmul.f32 %v840_v2, %v1011_v31 }
  0x1a   : > { %v1007_v28 = vld [vmem:[#allocation2 + $0x12] sm:$0xff]  ;;  %v258_v29 = vmul.f32 %v838_v1, %v1002_v23  ;;  %v260_v30 = vmul.f32 %v838_v1, %v1004_v24  ;;  %v322_v32 = vld [vmem:[#allocation2 + $0x4] sm:$0xff]  ;;  %v269_v33 = vadd.f32 %v839_v7, %v259_v25  ;;  %v1016_v36 = vld [vmem:[#allocation2 + $0x1a] sm:$0xff] }
  0x1b   : > { %v301_v26 = vadd.f32 %v297_v15, %v284_v18  ;;  %v1014_v35 = vld [vmem:[#allocation2 + $0xa] sm:$0xff]  ;;  %v1020_v41 = vld [vmem:[#allocation2 + $0x13] sm:$0xff]  ;;  %v299_v45 = vmul.f32 %v841_v8, %v1007_v28  ;;  %v1028_v47 = vld [vmem:[#allocation2 + $0x1b] sm:$0xff]  ;;  %v331_v49 = vmul.f32 %v998_v21, %v322_v32  ;;  %v300_v53 = vmul.f32 %v841_v8, %v1016_v36 }
  0x1c   : > { %v268_v37 = vadd.f32 %v839_v7, %v258_v29  ;;  %v270_v38 = vadd.f32 %v839_v7, %v260_v30  ;;  %v339_v42 = vld [vmem:[#allocation2 + $0x5] sm:$0xff]  ;;  %v286_v44 = vadd.f32 %v282_v34, %v269_v33  ;;  %v298_v52 = vmul.f32 %v841_v8, %v1014_v35  ;;  %v1033_v54 = vld [vmem:[#allocation2 + $0x14] sm:$0xff]  ;;  %v1052_v6 = vld [vmem:[#allocation2 + $0x1c] sm:$0xff] }
  0x1d   : > { %v1026_v46 = vld [vmem:[#allocation2 + $0xb] sm:$0xff]  ;;  %v318_v48 = vadd.f32 %v314_v27, %v301_v26  ;;  %v316_v58 = vmul.f32 %v842_v17, %v1020_v41  ;;  %v348_v61 = vmul.f32 %v844_v43, %v339_v42  ;;  %v317_v1 = vmul.f32 %v842_v17, %v1028_v47  ;;  %v1045_v2 = vld [vmem:[#allocation2 + $0x15] sm:$0xff]  ;;  %v1066_v15 = vld [vmem:[%s1397_s1 + $0x8] ss:$0 sm:$0xff] }
  0x1e   : > { %v285_v50 = vadd.f32 %v281_v39, %v268_v37  ;;  %v287_v51 = vadd.f32 %v283_v40, %v270_v38  ;;  %v356_v55 = vld [vmem:[#allocation2 + $0x6] sm:$0xff]  ;;  %v303_v57 = vadd.f32 %v299_v45, %v286_v44  ;;  %v315_v0 = vmul.f32 %v842_v17, %v1026_v46  ;;  %v1061_v14 = vld [vmem:[#allocation2 + $0x16] sm:$0xff]  ;;  %v1069_v18 = vld [vmem:[#allocation2 + $0xe] sm:$0xff] }
  0x1f   : > { %v1041_v59 = vld [vmem:[#allocation2 + $0xc] sm:$0xff]  ;;  %v335_v60 = vadd.f32 %v331_v49, %v318_v48  ;;  %v333_v7 = vmul.f32 %v998_v21, %v1033_v54  ;;  %v365_v10 = vmul.f32 %v1038_v56, %v356_v55  ;;  %v350_v17 = vmul.f32 %v844_v43, %v1045_v2  ;;  %v1075_v32 = vld [vmem:[#allocation2 + $0x17] sm:$0xff]  ;;  %v1080_v33 = vld [vmem:[%s1397_s1 + $0x9] ss:$0 sm:$0xff] }
  0x20   : > { %v302_v62 = vadd.f32 %v298_v52, %v285_v50  ;;  %v304_v63 = vadd.f32 %v300_v53, %v287_v51  ;;  %v373_v3 = vld [vmem:[#allocation2 + $0x7] sm:$0xff]  ;;  %v320_v5 = vadd.f32 %v316_v58, %v303_v57  ;;  %v332_v13 = vmul.f32 %v998_v21, %v1041_v59  ;;  %v1082_v34 = vld [vmem:[#allocation2 + $0x1d] sm:$0xff]  ;;  %v374_v39 = vld [vmem:[#allocation2 + $0xf] sm:$0xff] }
  0x21   : > { %v1056_v8 = vld [vmem:[#allocation2 + $0xd] sm:$0xff]  ;;  %v352_v9 = vadd.f32 %v348_v61, %v335_v60  ;;  %v382_v26 = vmul.f32 %v1050_v4, %v373_v3  ;;  %v334_v27 = vmul.f32 %v998_v21, %v1052_v6  ;;  %v367_v38 = vmul.f32 %v1038_v56, %v1061_v14  ;;  %v1093_v48 = vld [vmem:[%s1397_s1 + $0xa] ss:$0 sm:$0xff]  ;;  %v1104_v57 = vld [vmem:[%s1397_s1 + $0xb] ss:$0 sm:$0xff] }
  0x22   : > { %v319_v11 = vadd.f32 %v315_v0, %v302_v62  ;;  %v321_v12 = vadd.f32 %v317_v1, %v304_v63  ;;  %v337_v16 = vadd.f32 %v333_v7, %v320_v5  ;;  %v349_v30 = vmul.f32 %v844_v43, %v1056_v8  ;;  %v1106_v58 = vld [vmem:[#allocation2 + $0x1e] sm:$0xff]  ;;  %v1117_v1 = vld [vmem:[%s1397_s1 + $0xc] ss:$0 sm:$0xff] }
  0x23   : > { %v369_v25 = vadd.f32 %v365_v10, %v352_v9  ;;  %v396_v21 = vmul.f32 %v1066_v15, %v1002_v23  ;;  %v366_v45 = vmul.f32 %v1038_v56, %v1069_v18  ;;  %v384_v50 = vmul.f32 %v1050_v4, %v1075_v32 }
  0x24   : > { %v336_v29 = vadd.f32 %v332_v13, %v319_v11  ;;  %v354_v37 = vadd.f32 %v350_v17, %v337_v16  ;;  %v338_v42 = vadd.f32 %v334_v27, %v321_v12  ;;  %v410_v52 = vmul.f32 %v1080_v33, %v1000_v22  ;;  %v1130_v12 = vld [vmem:[%s1397_s1 + $0xd] ss:$0 sm:$0xff]  ;;  %v1132_v13 = vld [vmem:[#allocation2 + $0x1f] sm:$0xff] }
  0x25   : > { %v386_v40 = vadd.f32 %v382_v26, %v369_v25  ;;  %v351_v23 = vmul.f32 %v844_v43, %v1082_v34  ;;  %v383_v55 = vmul.f32 %v1050_v4, %v374_v39  ;;  %v398_v61 = vmul.f32 %v1066_v15, %v1004_v24 }
  0x26   : > { %v353_v44 = vadd.f32 %v349_v30, %v336_v29  ;;  %v371_v49 = vadd.f32 %v367_v38, %v354_v37  ;;  %v424_v22 = vmul.f32 %v1093_v48, %v1014_v35  ;;  %v397_v0 = vmul.f32 %v1066_v15, %v991_v19  ;;  %v1143_v29 = vld [vmem:[%s1397_s1 + $0xe] ss:$0 sm:$0xff] }
  0x27   : > { %v400_v51 = vadd.f32 %v396_v21, %v386_v40  ;;  %v355_v63 = vadd.f32 %v351_v23, %v338_v42  ;;  %v412_v5 = vmul.f32 %v1080_v33, %v1011_v31  ;;  %v438_v9 = vmul.f32 %v1104_v57, %v1026_v46 }
  0x28   : > { %v370_v53 = vadd.f32 %v366_v45, %v353_v44  ;;  %v388_v60 = vadd.f32 %v384_v50, %v371_v49  ;;  %v368_v35 = vmul.f32 %v1038_v56, %v1106_v58  ;;  %v411_v11 = vmul.f32 %v1080_v33, %v993_v20  ;;  %v1156_v44 = vld [vmem:[%s1397_s1 + $0xf] ss:$0 sm:$0xff]  ;;  %v1158_v45 = vld [vmem:[#allocation2 + $0x20] sm:$0xff] }
  0x29   : > { %v414_v62 = vadd.f32 %v410_v52, %v400_v51  ;;  %v426_v17 = vmul.f32 %v1093_v48, %v1016_v36  ;;  %v452_v46 = vmul.f32 %v1117_v1, %v1041_v59  ;;  %v425_v27 = vmul.f32 %v1093_v48, %v1007_v28 }
  0x2a   : > { %v387_v43 = vadd.f32 %v383_v55, %v370_v53  ;;  %v402_v3 = vadd.f32 %v398_v61, %v388_v60  ;;  %v372_v56 = vadd.f32 %v368_v35, %v355_v63  ;;  %v440_v37 = vmul.f32 %v1104_v57, %v1028_v47  ;;  %v1169_v53 = vld [vmem:[%s1397_s1 + $0x10] ss:$0 sm:$0xff] }
  0x2b   : > { %v428_v7 = vadd.f32 %v424_v22, %v414_v62  ;;  %v466_v40 = vmul.f32 %v1130_v12, %v1056_v8  ;;  %v385_v59 = vmul.f32 %v1050_v4, %v1132_v13  ;;  %v439_v42 = vmul.f32 %v1104_v57, %v1020_v41 }
  0x2c   : > { %v401_v10 = vadd.f32 %v397_v0, %v387_v43  ;;  %v416_v16 = vadd.f32 %v412_v5, %v402_v3  ;;  %v454_v50 = vmul.f32 %v1117_v1, %v1052_v6  ;;  %v480_v8 = vmul.f32 %v1143_v29, %v1069_v18  ;;  %v1181_v43 = vld [vmem:[%s1397_s1 + $0x11] ss:$0 sm:$0xff] }
  0x2d   : > { %v442_v25 = vadd.f32 %v438_v9, %v428_v7  ;;  %v389_v4 = vadd.f32 %v385_v59, %v372_v56  ;;  %v453_v23 = vmul.f32 %v1117_v1, %v1033_v54  ;;  %v468_v60 = vmul.f32 %v1130_v12, %v1082_v34  ;;  %v1187_v7 = vld [vmem:[#allocation2 + $0x21] sm:$0xff] }
  0x2e   : > { %v415_v26 = vadd.f32 %v411_v11, %v401_v10  ;;  %v430_v30 = vadd.f32 %v426_v17, %v416_v16  ;;  %v494_v62 = vmul.f32 %v1156_v44, %v374_v39  ;;  %v399_v18 = vmul.f32 %v1066_v15, %v1158_v45  ;;  %v1194_v10 = vld [vmem:[%s1397_s1 + $0x12] ss:$0 sm:$0xff] }
  0x2f   : > { %v456_v38 = vadd.f32 %v452_v46, %v442_v25  ;;  %v467_v63 = vmul.f32 %v1130_v12, %v1045_v2  ;;  %v482_v3 = vmul.f32 %v1143_v29, %v1106_v58  ;;  %v508_v39 = vmul.f32 %v1169_v53, %v991_v19  ;;  %v1200_v25 = vld [vmem:[#allocation2 + $0x22] sm:$0xff] }
  0x30   : > { %v429_v21 = vadd.f32 %v425_v27, %v415_v26  ;;  %v444_v49 = vadd.f32 %v440_v37, %v430_v30  ;;  %v403_v15 = vadd.f32 %v399_v18, %v389_v4  ;;  %v481_v35 = vmul.f32 %v1143_v29, %v1061_v14  ;;  %v1207_v26 = vld [vmem:[%s1397_s1 + $0x13] ss:$0 sm:$0xff] }
  0x31   : > { %v470_v51 = vadd.f32 %v466_v40, %v456_v38  ;;  %v496_v16 = vmul.f32 %v1156_v44, %v1132_v13  ;;  %v522_v19 = vmul.f32 %v1181_v43, %v993_v20  ;;  %v495_v56 = vmul.f32 %v1156_v44, %v1075_v32  ;;  %v1215_v40 = vld [vmem:[#allocation2 + $0x23] sm:$0xff] }
  0x32   : > { %v443_v52 = vadd.f32 %v439_v42, %v429_v21  ;;  %v458_v55 = vadd.f32 %v454_v50, %v444_v49  ;;  %v413_v27 = vmul.f32 %v1080_v33, %v1187_v7  ;;  %v510_v37 = vmul.f32 %v1169_v53, %v1158_v45  ;;  %v1222_v42 = vld [vmem:[%s1397_s1 + $0x14] ss:$0 sm:$0xff]  ;;  %v1226_v50 = vld [vmem:[#allocation2 + $0x24] sm:$0xff] }
  0x33   : > { %v484_v61 = vadd.f32 %v480_v8, %v470_v51  ;;  %v536_v20 = vmul.f32 %v1194_v10, %v1007_v28  ;;  %v509_v21 = vmul.f32 %v1169_v53, %v1004_v24  ;;  %v427_v49 = vmul.f32 %v1093_v48, %v1200_v25 }
  0x34   : > { %v457_v22 = vadd.f32 %v453_v23, %v443_v52  ;;  %v472_v0 = vadd.f32 %v468_v60, %v458_v55  ;;  %v417_v33 = vadd.f32 %v413_v27, %v403_v15  ;;  %v523_v28 = vmul.f32 %v1181_v43, %v1011_v31  ;;  %v1235_v23 = vld [vmem:[%s1397_s1 + $0x15] ss:$0 sm:$0xff]  ;;  %v1239_v60 = vld [vmem:[#allocation2 + $0x25] sm:$0xff] }
  0x35   : > { %v498_v5 = vadd.f32 %v494_v62, %v484_v61  ;;  %v550_v4 = vmul.f32 %v1207_v26, %v1020_v41  ;;  %v441_v48 = vmul.f32 %v1104_v57, %v1215_v40  ;;  %v524_v61 = vmul.f32 %v1181_v43, %v1187_v7  ;;  %v1252_v57 = vld [vmem:[%s1397_s1 + $0x16] ss:$0 sm:$0xff] }
  0x36   : > { %v471_v9 = vadd.f32 %v467_v63, %v457_v22  ;;  %v486_v11 = vadd.f32 %v482_v3, %v472_v0  ;;  %v431_v55 = vadd.f32 %v427_v49, %v417_v33  ;;  %v537_v62 = vmul.f32 %v1194_v10, %v1016_v36  ;;  %v1254_v3 = vld [vmem:[#allocation2 + $0x26] sm:$0xff] }
  0x37   : > { %v512_v17 = vadd.f32 %v508_v39, %v498_v5  ;;  %v564_v41 = vmul.f32 %v1222_v42, %v1033_v54  ;;  %v455_v22 = vmul.f32 %v1117_v1, %v1226_v50  ;;  %v538_v39 = vmul.f32 %v1194_v10, %v1200_v25 }
  0x38   : > { %v485_v46 = vadd.f32 %v481_v35, %v471_v9  ;;  %v500_v30 = vadd.f32 %v496_v16, %v486_v11  ;;  %v445_v0 = vadd.f32 %v441_v48, %v431_v55  ;;  %v551_v15 = vmul.f32 %v1207_v26, %v1028_v47  ;;  %v1267_v11 = vld [vmem:[%s1397_s1 + $0x17] ss:$0 sm:$0xff] }
  0x39   : > { %v526_v38 = vadd.f32 %v522_v19, %v512_v17  ;;  %v578_v1 = vmul.f32 %v1235_v23, %v1045_v2  ;;  %v469_v9 = vmul.f32 %v1130_v12, %v1239_v60  ;;  %v488_v17 = vld [vmem:[#allocation2 + $0x27] sm:$0xff]  ;;  %v592_v2 = vmul.f32 %v1252_v57, %v1061_v14 }
  0x3a   : > { %v499_v59 = vadd.f32 %v495_v56, %v485_v46  ;;  %v514_v51 = vadd.f32 %v510_v37, %v500_v30  ;;  %v459_v16 = vadd.f32 %v455_v22, %v445_v0  ;;  %v552_v46 = vmul.f32 %v1207_v26, %v1215_v40  ;;  %v1280_v37 = vld [vmem:[%s1397_s1 + $0x18] ss:$0 sm:$0xff]  ;;  %v530_v0 = vld [vmem:[#allocation2 + $0x2a] sm:$0xff] }
  0x3b   : > { %v540_v8 = vadd.f32 %v536_v20, %v526_v38  ;;  %v565_v56 = vmul.f32 %v1222_v42, %v1052_v6  ;;  %v483_v12 = vmul.f32 %v1143_v29, %v1254_v3  ;;  %v502_v20 = vld [vmem:[#allocation2 + $0x28] sm:$0xff]  ;;  %v579_v33 = vmul.f32 %v1235_v23, %v1082_v34 }
  0x3c   : > { %v513_v52 = vadd.f32 %v509_v21, %v499_v59  ;;  %v528_v5 = vadd.f32 %v524_v61, %v514_v51  ;;  %v473_v38 = vadd.f32 %v469_v9, %v459_v16  ;;  %v566_v21 = vmul.f32 %v1222_v42, %v1226_v50  ;;  %v516_v61 = vld [vmem:[#allocation2 + $0x29] sm:$0xff] }
  0x3d   : > { %v554_v18 = vadd.f32 %v550_v4, %v540_v8  ;;  %v606_v14 = vmul.f32 %v1267_v11, %v1075_v32  ;;  %v497_v29 = vmul.f32 %v1156_v44, %v488_v17  ;;  %v593_v55 = vmul.f32 %v1252_v57, %v1106_v58  ;;  %v544_v16 = vld [vmem:[#allocation2 + $0x2b] sm:$0xff] }
  0x3e   : > { %v527_v63 = vadd.f32 %v523_v28, %v513_v52  ;;  %v542_v19 = vadd.f32 %v538_v39, %v528_v5  ;;  %v1292_v28 = vld [vmem:[%s1397_s1 + $0x19] ss:$0 sm:$0xff]  ;;  %v487_v8 = vadd.f32 %v483_v12, %v473_v38  ;;  %v580_v52 = vmul.f32 %v1235_v23, %v1239_v60  ;;  %v558_v12 = vld [vmem:[#allocation2 + $0x2c] sm:$0xff]  ;;  %v1338_v38 = vld [vmem:[%s1397_s1 + $0x1d] ss:$0 sm:$0xff] }
  0x3f   : > { %v568_v54 = vadd.f32 %v564_v41, %v554_v18  ;;  %v620_v32 = vmul.f32 %v1280_v37, %v1004_v24  ;;  %v511_v44 = vmul.f32 %v1169_v53, %v502_v20  ;;  %v1304_v18 = vld [vmem:[%s1397_s1 + $0x1a] ss:$0 sm:$0xff]  ;;  %v634_v39 = vmul.f32 %v1292_v28, %v1011_v31 }
  0x40   : > { %v541_v35 = vadd.f32 %v537_v62, %v527_v63  ;;  %v556_v59 = vadd.f32 %v552_v46, %v542_v19  ;;  %v501_v41 = vadd.f32 %v497_v29, %v487_v8  ;;  %v594_v63 = vmul.f32 %v1252_v57, %v1254_v3  ;;  %v1327_v46 = vld [vmem:[%s1397_s1 + $0x1c] ss:$0 sm:$0xff]  ;;  %v869_v29 = vld [vmem:[%s1397_s1 + $0x1e] ss:$0 sm:$0xff] }
  0x41   : > { %v582_v27 = vadd.f32 %v578_v1, %v568_v54  ;;  %v607_v24 = vmul.f32 %v1267_v11, %v1132_v13  ;;  %v608_v53 = vmul.f32 %v1267_v11, %v488_v17  ;;  %v1316_v54 = vld [vmem:[%s1397_s1 + $0x1b] ss:$0 sm:$0xff]  ;;  %v648_v31 = vmul.f32 %v1304_v18, %v1016_v36 }
  0x42   : > { %v555_v30 = vadd.f32 %v551_v15, %v541_v35  ;;  %v570_v4 = vadd.f32 %v566_v21, %v556_v59  ;;  %v515_v1 = vadd.f32 %v511_v44, %v501_v41  ;;  %v525_v35 = vmul.f32 %v1181_v43, %v516_v61 }
  0x43   : > { %v596_v49 = vadd.f32 %v592_v2, %v582_v27  ;;  %v621_v13 = vmul.f32 %v1280_v37, %v1158_v45  ;;  %v539_v17 = vmul.f32 %v1194_v10, %v530_v0  ;;  %v622_v43 = vmul.f32 %v1280_v37, %v502_v20 }
  0x44   : > { %v569_v51 = vadd.f32 %v565_v56, %v555_v30  ;;  %v584_v22 = vadd.f32 %v580_v52, %v570_v4  ;;  %v529_v2 = vadd.f32 %v525_v35, %v515_v1  ;;  %v662_v36 = vmul.f32 %v1316_v54, %v1028_v47  ;;  %v586_v4 = vld [vmem:[#allocation2 + $0x2e] sm:$0xff] }
  0x45   : > { %v610_v48 = vadd.f32 %v606_v14, %v596_v49  ;;  %v635_v45 = vmul.f32 %v1292_v28, %v1187_v7  ;;  %v553_v10 = vmul.f32 %v1207_v26, %v544_v16  ;;  %v636_v20 = vmul.f32 %v1292_v28, %v516_v61  ;;  %v600_v61 = vld [vmem:[#allocation2 + $0x2f] sm:$0xff] }
  0x46   : > { %v583_v62 = vadd.f32 %v579_v33, %v569_v51  ;;  %v598_v9 = vadd.f32 %v594_v63, %v584_v22  ;;  %v543_v21 = vadd.f32 %v539_v17, %v529_v2  ;;  %v572_v33 = vld [vmem:[#allocation2 + $0x2d] sm:$0xff]  ;;  %v676_v47 = vmul.f32 %v1327_v46, %v1052_v6 }
  0x47   : > { %v624_v5 = vadd.f32 %v620_v32, %v610_v48  ;;  %v649_v7 = vmul.f32 %v1304_v18, %v1200_v25  ;;  %v567_v26 = vmul.f32 %v1222_v42, %v558_v12  ;;  %v690_v6 = vmul.f32 %v1338_v38, %v1082_v34 }
  0x48   : > { %v597_v15 = vadd.f32 %v593_v55, %v583_v62  ;;  %v612_v27 = vadd.f32 %v608_v53, %v598_v9  ;;  %v557_v8 = vadd.f32 %v553_v10, %v543_v21  ;;  %v650_v55 = vmul.f32 %v1304_v18, %v530_v0  ;;  %v684_v10 = vld [vmem:[#allocation2 + $0x35] sm:$0xff] }
  0x49   : > { %v638_v19 = vadd.f32 %v634_v39, %v624_v5  ;;  %v663_v25 = vmul.f32 %v1316_v54, %v1215_v40  ;;  %v581_v42 = vmul.f32 %v1235_v23, %v572_v33  ;;  %v664_v41 = vmul.f32 %v1316_v54, %v544_v16  ;;  %v614_v23 = vld [vmem:[#allocation2 + $0x30] sm:$0xff] }
  0x4a   : > { %v611_v56 = vadd.f32 %v607_v24, %v597_v15  ;;  %v626_v49 = vadd.f32 %v622_v43, %v612_v27  ;;  %v571_v44 = vadd.f32 %v567_v26, %v557_v8  ;;  %v704_v63 = vmul.f32 %v869_v29, %v1106_v58  ;;  %v656_v43 = vld [vmem:[#allocation2 + $0x33] sm:$0xff] }
  0x4b   : > { %v652_v30 = vadd.f32 %v648_v31, %v638_v19  ;;  %v677_v0 = vmul.f32 %v1327_v46, %v1226_v50  ;;  %v595_v5 = vmul.f32 %v1252_v57, %v586_v4  ;;  %v678_v24 = vmul.f32 %v1327_v46, %v558_v12  ;;  %v628_v19 = vld [vmem:[#allocation2 + $0x31] sm:$0xff] }
  0x4c   : > { %v625_v59 = vadd.f32 %v621_v13, %v611_v56  ;;  %v640_v52 = vadd.f32 %v636_v20, %v626_v49  ;;  %v585_v40 = vadd.f32 %v581_v42, %v571_v44  ;;  %v691_v58 = vmul.f32 %v1338_v38, %v1239_v60  ;;  %v642_v56 = vld [vmem:[#allocation2 + $0x32] sm:$0xff] }
  0x4d   : > { %v666_v14 = vadd.f32 %v662_v36, %v652_v30  ;;  %v609_v50 = vmul.f32 %v1267_v11, %v600_v61  ;;  %v692_v9 = vmul.f32 %v1338_v38, %v572_v33  ;;  %v705_v35 = vmul.f32 %v869_v29, %v1254_v3  ;;  %v670_v30 = vld [vmem:[#allocation2 + $0x34] sm:$0xff] }
  0x4e   : > { %v639_v51 = vadd.f32 %v635_v45, %v625_v59  ;;  %v654_v62 = vadd.f32 %v650_v55, %v640_v52  ;;  %v599_v15 = vadd.f32 %v595_v5, %v585_v40  ;;  %v623_v16 = vmul.f32 %v1280_v37, %v614_v23  ;;  %v698_v33 = vld [vmem:[#allocation2 + $0x36] sm:$0xff] }
  0x4f   : > { %v680_v48 = vadd.f32 %v676_v47, %v666_v14  ;;  %v706_v60 = vmul.f32 %v869_v29, %v586_v4  ;;  %v637_v12 = vmul.f32 %v1292_v28, %v628_v19  ;;  %v651_v37 = vmul.f32 %v1304_v18, %v642_v56 }
  0x50   : > { %v653_v32 = vadd.f32 %v649_v7, %v639_v51  ;;  %v668_v39 = vadd.f32 %v664_v41, %v654_v62  ;;  %v613_v13 = vadd.f32 %v609_v50, %v599_v15  ;;  %v665_v45 = vmul.f32 %v1316_v54, %v656_v43 }
  0x51   : > { %v694_v22 = vadd.f32 %v690_v6, %v680_v48  ;;  %v679_v21 = vmul.f32 %v1327_v46, %v670_v30  ;;  %v693_v28 = vmul.f32 %v1338_v38, %v684_v10  ;;  %v707_v14 = vmul.f32 %v869_v29, %v698_v33 }
  0x52   : > { %v667_v34 = vadd.f32 %v663_v25, %v653_v32  ;;  %v682_v1 = vadd.f32 %v678_v24, %v668_v39  ;;  %v627_v27 = vadd.f32 %v623_v16, %v613_v13 }
  0x53   : > { %v708_v53 = vadd.f32 %v704_v63, %v694_v22 }
  0x54   : > { %v681_v57 = vadd.f32 %v677_v0, %v667_v34  ;;  %v696_v17 = vadd.f32 %v692_v9, %v682_v1  ;;  %v641_v3 = vadd.f32 %v637_v12, %v627_v27 }
  0x55   : > { %712 = vst.msk [vmem:[%s1365_s20] sm:$0xff] %vm233_vm0, %v708_v53 }
  0x56   : > { %v695_v31 = vadd.f32 %v691_v58, %v681_v57  ;;  %v710_v2 = vadd.f32 %v706_v60, %v696_v17  ;;  %v655_v36 = vadd.f32 %v651_v37, %v641_v3 }
  0x58   : > { %v709_v11 = vadd.f32 %v705_v35, %v695_v31  ;;  %714 = vst.msk [vmem:[%s1365_s20 + $0x10] sm:$0xff] %vm233_vm0, %v710_v2  ;;  %v669_v59 = vadd.f32 %v665_v45, %v655_v36 }
  0x5a   : > { %713 = vst.msk [vmem:[%s1365_s20 + $0x8] sm:$0xff] %vm233_vm0, %v709_v11  ;;  %v683_v49 = vadd.f32 %v679_v21, %v669_v59 }
  0x5c   : > { %v697_v20 = vadd.f32 %v693_v28, %v683_v49 }
  0x5e   : > { %v711_v47 = vadd.f32 %v707_v14, %v697_v20 }
  0x60   : > { %715 = vst.msk [vmem:[%s1365_s20 + $0x18] sm:$0xff] %vm233_vm0, %v711_v47 }
  0x61 PF: > { %s13_s14 = sadd.s32 1, %s921_s14   ;;  %s1400_s12 = smov %s917_s13 }
  0x62   : > { %p10_p5 = scmp.ge.s32.totalorder %s13_s14, 4   ;;  %s1401_s13 = smov %s1403_s15 }
  0x64   :  { %12 = sbr.rel (!%p10_p5) target bundleno = 2 (0x2), region = 68 }

</bundles_post_ra>
